<compile_context>
chip_gen: v5e
topology: v5e:2x2
jax: 0.10.0
libtpu: 0.0.40
codegen_flags: <defaults>
</compile_context>

<pallas_src>
import functools

import jax
import jax.numpy as jnp
from jax import lax
from jax.experimental import pallas as pl
from jax.experimental.pallas import tpu as pltpu

DEFAULT_EPSILON = 2e-20

# ~1M elements per input block: 4 MiB for f32, 2 MiB for bf16.  Element-based (not
# byte-based) so the f32 intermediates of a bf16 block do not blow past the VMEM limit.
_TARGET_BLOCK_ELEMS = 1 << 20
# Safe on every generation: v7x physical VMEM is 64 MiB, v5e/v6e have 128 MiB.
_VMEM_LIMIT_BYTES = 48 * 1024 * 1024


def _jsdiv_kernel(p_ref, q_ref, o_ref, acc_ref, *,
                  total_rows, total_cols, block_rows, block_cols, acc_rows,
                  num_tiles, inner_steps, c_steps,
                  need_row_mask, need_col_mask, need_step_gate, approx_recip):
    c = pl.program_id(0)
    i = pl.program_id(1)
    k = pl.program_id(2)
    tile = c * inner_steps + i            # logical (unclamped) batch-tile index

    @pl.when(jnp.logical_and(i == 0, k == 0))
    def _init():
        acc_ref[...] = jnp.zeros_like(acc_ref)

    def _compute():
        # bf16 inputs are accepted; all math runs in f32.
        p = p_ref[...].astype(jnp.float32)
        q = q_ref[...].astype(jnp.float32)

        eps = jnp.float32(DEFAULT_EPSILON)
        two_eps = jnp.float32(2.0 * DEFAULT_EPSILON)
        two = jnp.float32(2.0)

        # Shared reciprocal of the mixture denominator: 2 logs + 1 recip per pair.
        inv = pl.reciprocal(p + q + two_eps, approx=approx_recip)
        elem = (p * jnp.log(two * (p + eps) * inv)
                + q * jnp.log(two * (q + eps) * inv))

        # Ragged-edge masking: OOB rows/lanes of the last tile may hold garbage (and can
        # produce NaN above); a single select on `elem` zeroes their contribution
        # (TPU select does not propagate values from the unselected branch).
        if need_row_mask:
            row = (lax.broadcasted_iota(jnp.int32, (block_rows, 1), 0)
                   + tile * block_rows)
            elem = jnp.where(row < total_rows, elem, jnp.float32(0.0))
        if need_col_mask:
            col = (lax.broadcasted_iota(jnp.int32, (1, block_cols), 1)
                   + k * block_cols)
            elem = jnp.where(col < total_cols, elem, jnp.float32(0.0))

        # Element-wise accumulation on the VALU (leading-axis reshape is layout-free);
        # the lane/sublane (XLU) reduce happens exactly once per core, in the finalize.
        groups = block_rows // acc_rows
        if groups > 1:
            acc_ref[...] += elem.reshape(groups, acc_rows, block_cols).sum(axis=0)
        else:
            acc_ref[...] += elem

    if need_step_gate:
        # Fully-padded (clamped) grid steps skip all EUP/VALU work.
        pl.when(tile < num_tiles)(_compute)
    else:
        _compute()

    @pl.when(jnp.logical_and(i == inner_steps - 1, k == c_steps - 1))
    def _finalize():
        rows = jnp.sum(acc_ref[...], axis=-1, keepdims=True)     # lane reduce
        o_ref[...] = jnp.sum(rows, axis=0, keepdims=True)        # sublane reduce


def _choose_tiles(batch, channels):
    """Pick (block_rows, block_cols) targeting ~_TARGET_BLOCK_ELEMS per input block."""
    rows = (_TARGET_BLOCK_ELEMS // max(channels, 1)) // 8 * 8
    if rows >= 8:
        tb = batch if batch <= rows else rows       # full batch or a multiple of 8
        return tb, channels
    # Extremely wide distributions (C > ~128K): tile the lane axis too so the kernel
    # stays double-buffered within the VMEM limit on every generation (incl. v7x).
    tb = batch if batch < 8 else 8
    tc = max(128, (_TARGET_BLOCK_ELEMS // max(tb, 1)) // 128 * 128)
    tc = channels if tc >= channels else tc
    return tb, tc


def js_div_loss(p, q, *, block_rows=None, block_cols=None, approx_reciprocal=False):
    """Jensen-Shannon divergence with reduction='mean', dim=-1.

    p, q: (B, C) probability distributions along the last axis (f32 or bf16).
    Returns a scalar float32.
    """
    assert p.shape == q.shape and p.ndim == 2, (p.shape, q.shape)
    assert p.dtype == q.dtype, (p.dtype, q.dtype)
    B, C = p.shape

    tb, tc = _choose_tiles(B, C)
    if block_rows is not None:                      # sanitize user override
        assert block_rows >= 1, block_rows
        tb = B if block_rows >= B else max(8, (block_rows // 8) * 8)
    if block_cols is not None:
        assert block_cols >= 1, block_cols
        tc = C if block_cols >= C else max(128, (block_cols // 128) * 128)

    num_tiles = pl.cdiv(B, tb)                      # batch tiles
    c_steps = pl.cdiv(C, tc)                        # lane tiles
    # Split batch tiles over (up to) 2 TensorCores; on single-TC chips (v5e/v6e) the
    # outer "parallel" axis runs sequentially at near-zero cost, on v7x it shards so
    # each TC uses its own EUP / HBM port.
    num_cores = 2 if num_tiles >= 2 else 1
    inner_steps = pl.cdiv(num_tiles, num_cores)

    need_step_gate = (num_cores * inner_steps) != num_tiles
    need_row_mask = (num_tiles * tb) != B
    need_col_mask = (c_steps * tc) != C
    acc_rows = 8 if tb % 8 == 0 else tb

    def in_index_map(c, i, k):
        tile = c * inner_steps + i
        # Clamp so padded grid steps still DMA a valid tile (their work is skipped).
        return (jnp.minimum(tile, num_tiles - 1), k)

    kernel = functools.partial(
        _jsdiv_kernel,
        total_rows=B, total_cols=C, block_rows=tb, block_cols=tc, acc_rows=acc_rows,
        num_tiles=num_tiles, inner_steps=inner_steps, c_steps=c_steps,
        need_row_mask=need_row_mask, need_col_mask=need_col_mask,
        need_step_gate=need_step_gate, approx_recip=approx_reciprocal)

    itemsize = jnp.dtype(p.dtype).itemsize
    cost = pl.CostEstimate(
        flops=int(12 * B * C),
        transcendentals=int(3 * B * C),
        bytes_accessed=int(2 * B * C * itemsize + num_cores * 4),
    )

    partials = pl.pallas_call(
        kernel,
        out_shape=jax.ShapeDtypeStruct((num_cores, 1, 1), jnp.float32),
        grid=(num_cores, inner_steps, c_steps),
        in_specs=[
            pl.BlockSpec((tb, tc), in_index_map),
            pl.BlockSpec((tb, tc), in_index_map),
        ],
        out_specs=pl.BlockSpec((None, 1, 1), lambda c, i, k: (c, 0, 0)),
        scratch_shapes=[pltpu.VMEM((acc_rows, tc), jnp.float32)],
        compiler_params=pltpu.CompilerParams(
            dimension_semantics=("parallel", "arbitrary", "arbitrary"),
            vmem_limit_bytes=_VMEM_LIMIT_BYTES,
        ),
        cost_estimate=cost,
    )(p, q)

    # Final cross-core sum, mean over the true batch size and the 0.5 JS factor.
    return jnp.sum(partials) * jnp.float32(0.5 / B)


def _js_div_loss_ref(p, q, eps=DEFAULT_EPSILON):
    """Pure-JAX mirror of the PyTorch JSDivLoss (reduction='mean', dim=-1)."""

    def H(x):
        ent = -jnp.sum(x * jnp.log(x + eps), axis=-1)
        return jnp.mean(ent)

    m = 0.5 * (p + q)
    return H(m) - 0.5 * (H(p) + H(q))


# TODO(synk): only the module's default config (reduction='mean', dim=-1, natural log,
# log_input=False) is implemented; other reductions / log bases are not translated.

if __name__ == "__main__":
    key = jax.random.PRNGKey(0)
    kp, kq, kp2, kq2, kp4, kq4 = jax.random.split(key, 6)

    # Case 1: small module-consistent shape (batch=8 distributions over 128 classes).
    B, C = 8, 128
    p = jax.nn.softmax(jax.random.normal(kp, (B, C), dtype=jnp.float32), axis=-1)
    q = jax.nn.softmax(jax.random.normal(kq, (B, C), dtype=jnp.float32), axis=-1)
    out = jax.block_until_ready(js_div_loss(p, q))
    ref = _js_div_loss_ref(p, q)
    assert jnp.allclose(out, ref, rtol=1e-5, atol=1e-5), (out, ref)

    # Case 2: ragged batch, 2-way "parallel" split, padded-step gating + row masking.
    B2, C2 = 20, 256
    p2 = jax.nn.softmax(jax.random.normal(kp2, (B2, C2), dtype=jnp.float32), axis=-1)
    q2 = jax.nn.softmax(jax.random.normal(kq2, (B2, C2), dtype=jnp.float32), axis=-1)
    out2 = jax.block_until_ready(js_div_loss(p2, q2, block_rows=8))
    ref2 = _js_div_loss_ref(p2, q2)
    assert jnp.allclose(out2, ref2, rtol=1e-5, atol=1e-5), (out2, ref2)

    # Case 3: bf16 inputs (kernel upcasts to f32 internally); ref uses the same values.
    p_bf = p.astype(jnp.bfloat16)
    q_bf = q.astype(jnp.bfloat16)
    out3 = jax.block_until_ready(js_div_loss(p_bf, q_bf))
    ref3 = _js_div_loss_ref(p_bf.astype(jnp.float32), q_bf.astype(jnp.float32))
    assert jnp.allclose(out3, ref3, rtol=1e-5, atol=1e-5), (out3, ref3)

    # Case 4: lane-axis (C) tiling path with a ragged last C tile (in-kernel lane
    # masking) and the grouped VALU accumulation (block_rows = 16 -> groups = 2).
    B4, C4 = 16, 200
    p4 = jax.nn.softmax(jax.random.normal(kp4, (B4, C4), dtype=jnp.float32), axis=-1)
    q4 = jax.nn.softmax(jax.random.normal(kq4, (B4, C4), dtype=jnp.float32), axis=-1)
    out4 = jax.block_until_ready(js_div_loss(p4, q4, block_cols=128))
    ref4 = _js_div_loss_ref(p4, q4)
    assert jnp.allclose(out4, ref4, rtol=1e-5, atol=1e-5), (out4, ref4)

    print("KERNEL_OK")
</pallas_src>

<mosaic_0001>
module attributes {stable_mosaic.version = 11 : i64} {
  func.func @_jsdiv_kernel(%arg0: i32, %arg1: i32, %arg2: i32, %arg3: memref<8x128xf32, #tpu.memory_space<vmem>>, %arg4: memref<8x128xf32, #tpu.memory_space<vmem>>, %arg5: memref<1x1x1xf32, #tpu.memory_space<vmem>>, %arg6: memref<8x128xf32, #tpu.memory_space<vmem>>) attributes {dimension_semantics = [#tpu.dimension_semantics<parallel>, #tpu.dimension_semantics<arbitrary>, #tpu.dimension_semantics<arbitrary>], iteration_bounds = array<i64: 1, 1, 1>, scalar_prefetch = 0 : i64, scratch_operands = 1 : i64, tpu.core_type = #tpu.core_type<tc>, window_params = [{transform_indices = @transform_0, window_bounds = array<i64: 8, 128>}, {transform_indices = @transform_1, window_bounds = array<i64: 8, 128>}, {transform_indices = @transform_2, window_bounds = array<i64: 1, 1, 1>}]} {
    %c0_i32 = arith.constant 0 : i32
    %0 = arith.cmpi eq, %arg1, %c0_i32 : i32
    %c0_i32_0 = arith.constant 0 : i32
    %1 = arith.cmpi eq, %arg2, %c0_i32_0 : i32
    %2 = arith.andi %0, %1 : i1
    %3 = arith.extui %2 : i1 to i32
    %c0_i32_1 = arith.constant 0 : i32
    %4 = arith.cmpi ne, %3, %c0_i32_1 : i32
    scf.if %4 {
      %cst_16 = arith.constant 0.000000e+00 : f32
      %34 = vector.broadcast %cst_16 : f32 to vector<8x128xf32>
      %c0_17 = arith.constant 0 : index
      %c0_18 = arith.constant 0 : index
      %35 = vector.load %arg6[%c0_17, %c0_18] : memref<8x128xf32, #tpu.memory_space<vmem>>, vector<8x128xf32>
      tpu.vector_store %arg6[%c0_17, %c0_18], %34 {strides = array<i32>} : memref<8x128xf32, #tpu.memory_space<vmem>>, vector<8x128xf32>,
    } else {
    }
    %c0 = arith.constant 0 : index
    %c0_2 = arith.constant 0 : index
    %5 = vector.load %arg3[%c0, %c0_2] : memref<8x128xf32, #tpu.memory_space<vmem>>, vector<8x128xf32>
    %c0_3 = arith.constant 0 : index
    %c0_4 = arith.constant 0 : index
    %6 = vector.load %arg4[%c0_3, %c0_4] : memref<8x128xf32, #tpu.memory_space<vmem>>, vector<8x128xf32>
    %7 = arith.addf %5, %6 : vector<8x128xf32>
    %cst = arith.constant 4.000000e-20 : f32
    %8 = vector.broadcast %cst : f32 to vector<8x128xf32>
    %9 = arith.addf %7, %8 : vector<8x128xf32>
    %10 = tpu.reciprocal %9 : vector<8x128xf32> -> vector<8x128xf32>
    %cst_5 = arith.constant 2.000000e-20 : f32
    %11 = vector.broadcast %cst_5 : f32 to vector<8x128xf32>
    %12 = arith.addf %5, %11 : vector<8x128xf32>
    %cst_6 = arith.constant 2.000000e+00 : f32
    %13 = vector.broadcast %cst_6 : f32 to vector<8x128xf32>
    %14 = arith.mulf %13, %12 : vector<8x128xf32>
    %15 = arith.mulf %14, %10 : vector<8x128xf32>
    %16 = math.log %15 : vector<8x128xf32>
    %17 = arith.mulf %5, %16 : vector<8x128xf32>
    %cst_7 = arith.constant 2.000000e-20 : f32
    %18 = vector.broadcast %cst_7 : f32 to vector<8x128xf32>
    %19 = arith.addf %6, %18 : vector<8x128xf32>
    %cst_8 = arith.constant 2.000000e+00 : f32
    %20 = vector.broadcast %cst_8 : f32 to vector<8x128xf32>
    %21 = arith.mulf %20, %19 : vector<8x128xf32>
    %22 = arith.mulf %21, %10 : vector<8x128xf32>
    %23 = math.log %22 : vector<8x128xf32>
    %24 = arith.mulf %6, %23 : vector<8x128xf32>
    %25 = arith.addf %17, %24 : vector<8x128xf32>
    %c0_9 = arith.constant 0 : index
    %c0_10 = arith.constant 0 : index
    %26 = vector.load %arg6[%c0_9, %c0_10] : memref<8x128xf32, #tpu.memory_space<vmem>>, vector<8x128xf32>
    %27 = arith.addf %26, %25 : vector<8x128xf32>
    %c0_11 = arith.constant 0 : index
    %c0_12 = arith.constant 0 : index
    %28 = vector.load %arg6[%c0_11, %c0_12] : memref<8x128xf32, #tpu.memory_space<vmem>>, vector<8x128xf32>
    tpu.vector_store %arg6[%c0_11, %c0_12], %27 {strides = array<i32>} : memref<8x128xf32, #tpu.memory_space<vmem>>, vector<8x128xf32>,
    %c0_i32_13 = arith.constant 0 : i32
    %29 = arith.cmpi eq, %arg1, %c0_i32_13 : i32
    %c0_i32_14 = arith.constant 0 : i32
    %30 = arith.cmpi eq, %arg2, %c0_i32_14 : i32
    %31 = arith.andi %29, %30 : i1
    %32 = arith.extui %31 : i1 to i32
    %c0_i32_15 = arith.constant 0 : i32
    %33 = arith.cmpi ne, %32, %c0_i32_15 : i32
    scf.if %33 {
      %c0_16 = arith.constant 0 : index
      %c0_17 = arith.constant 0 : index
      %34 = vector.load %arg6[%c0_16, %c0_17] : memref<8x128xf32, #tpu.memory_space<vmem>>, vector<8x128xf32>
      %cst_18 = arith.constant dense<0.000000e+00> : vector<8xf32>
      %35 = vector.multi_reduction <add>, %34, %cst_18 [1] : vector<8x128xf32> to vector<8xf32>
      %36 = vector.shape_cast %35 : vector<8xf32> to vector<8x1xf32>
      %cst_19 = arith.constant dense<0.000000e+00> : vector<1xf32>
      %37 = vector.multi_reduction <add>, %36, %cst_19 [0] : vector<8x1xf32> to vector<1xf32>
      %38 = vector.shape_cast %37 : vector<1xf32> to vector<1x1xf32>
      %c0_20 = arith.constant 0 : index
      %c0_21 = arith.constant 0 : index
      %c0_22 = arith.constant 0 : index
      %39 = vector.load %arg5[%c0_20, %c0_21, %c0_22] : memref<1x1x1xf32, #tpu.memory_space<vmem>>, vector<1x1x1xf32>
      %40 = vector.shape_cast %39 : vector<1x1x1xf32> to vector<1x1xf32>
      %41 = vector.shape_cast %38 : vector<1x1xf32> to vector<1x1x1xf32>
      tpu.vector_store %arg5[%c0_20, %c0_21, %c0_22], %41 {strides = array<i32>} : memref<1x1x1xf32, #tpu.memory_space<vmem>>, vector<1x1x1xf32>,
    } else {
    }
    return
  }
  func.func @transform_0(%arg0: i32, %arg1: i32, %arg2: i32) -> (i32, i32) {
    %c1_i32 = arith.constant 1 : i32
    %0 = arith.muli %arg0, %c1_i32 : i32
    %1 = arith.addi %0, %arg1 : i32
    %c0_i32 = arith.constant 0 : i32
    %2 = arith.minsi %1, %c0_i32 : i32
    %c0_i32_0 = arith.constant 0 : i32
    return %2, %arg2 : i32, i32
  }
  func.func @transform_1(%arg0: i32, %arg1: i32, %arg2: i32) -> (i32, i32) {
    %c1_i32 = arith.constant 1 : i32
    %0 = arith.muli %arg0, %c1_i32 : i32
    %1 = arith.addi %0, %arg1 : i32
    %c0_i32 = arith.constant 0 : i32
    %2 = arith.minsi %1, %c0_i32 : i32
    %c0_i32_0 = arith.constant 0 : i32
    return %2, %arg2 : i32, i32
  }
  func.func @transform_2(%arg0: i32, %arg1: i32, %arg2: i32) -> (i32, i32, i32) {
    %c0_i32 = arith.constant 0 : i32
    %c0_i32_0 = arith.constant 0 : i32
    %c0_i32_1 = arith.constant 0 : i32
    return %arg0, %c0_i32, %c0_i32_0 : i32, i32, i32
  }
}

</mosaic_0001>

<bundles_post_ra>
// kernel: tpu_custom_call.1
= control target key start
LH: loop header
LB: loop body
LE: loop exit
PB: predicated region body
PF: predicated region fallthrough
CT: control target
= control target key end

     0   :  { %7 = vsyncpa [#allocation4], 0  ;;  %s246_s0 = inlined_call_operand.hbm [shape: f32[8,128], index: 0, kind: input, shape index: {}]   ;;  %s247_s1 = inlined_call_operand.hbm [shape: f32[8,128], index: 1, kind: input, shape index: {}]   ;;  %s248_s2 = inlined_call_operand.hbm [shape: f32[1,1,1], index: 2, kind: output, shape index: {}]  }
   0x1   :  { %8 = vsyncpa [#allocation7], 0 }
   0x2   :  { %9 = vsyncpa [#allocation5], 0  ;;  %s20_s11 = sshll.u32 %s246_s0, 4  ;;  %s219_s12 = smov [#allocation3]   ;;  %s21_s11 = int_to_ptr.hbm [resolvable:$true] %s20_s11 }
   0x3   :  { %s22_s13 = sshll.u32 %s219_s12, 4  ;;  %s36_s16 = sshll.u32 %s247_s1, 4  ;;  %s23_s13 = int_to_ptr.vmem [resolvable:$true] %s22_s13  ;;  %s37_s16 = int_to_ptr.hbm [resolvable:$true] %s36_s16 }
   0x4   :  { %25 = dma.hbm_to_vmem [thread:$0]  %s21_s11, 128, %s23_s13, [#allocation4]  }
   0x5   :  { %s220_s17 = smov [#allocation6]  }
   0x6   :  { %s38_s18 = sshll.u32 %s220_s17, 4  ;;  %s39_s18 = int_to_ptr.vmem [resolvable:$true] %s38_s18 }
   0x7   :  { %41 = dma.hbm_to_vmem [thread:$0]  %s37_s16, 128, %s39_s18, [#allocation7]  }
   0x8   :  { %213 = dma.done.wait [#allocation4], 128  }
   0x9   :  { %214 = vsyncadd [#allocation4], 4294967168 }
   0xa   :  { %215 = dma.done.wait [#allocation7], 128  }
   0xb   :  { %216 = vsyncadd [#allocation7], 4294967168  ;;  %v63_v0 = vld [vmem:[#allocation3] sm:$0xff]  ;;  %v64_v1 = vld [vmem:[#allocation6] sm:$0xff]  ;;  %s221_s0 = smov [#allocation8]   ;;  %s117_s21 = sshll.u32 %s248_s2, 4  ;;  %s118_s21 = int_to_ptr.hbm [resolvable:$true] %s117_s21 }
   0xc   :  { %v65_v2 = vadd.f32 %v64_v1, %v63_v0  ;;  %v81_v7 = vadd.f32 2e-20, %v63_v0  ;;  %v87_v8 = vadd.f32 2e-20, %v64_v1  ;;  %s115_s1 = sshll.u32 %s221_s0, 4  ;;  %vm108_vm4 = vcmask 0   ;;  %s116_s1 = int_to_ptr.vmem [resolvable:$true] %s115_s1 }
   0xe   :  { %v66_v3 = vadd.f32 4e-20, %v65_v2  ;;  %v82_v14 = vmul.f32 2.0, %v81_v7  ;;  %v88_v15 = vmul.f32 2.0, %v87_v8 }
  0x10   :  { %135 = vrcp.f32 %v66_v3  ;;  %v78_v6 = vand.u32 2147483648, %v66_v3  ;;  %vm72_vm0 = vweird.f32 %v66_v3  ;;  %v76_v10 = vand.u32 2147483647, %v66_v3 }
  0x12   :  { %v79_v12 = vor.u32 1.1754944e-38, %v78_v6  ;;  %vm77_vm3 = vcmp.eq.f32.partialorder %v76_v10, 8.507059e+37 }
  0x16   :  { %v136_v4 = vpop.eup %135 }
  0x17   :  { %v68_v5 = vmul.f32 %v136_v4, %v66_v3  ;;  %vm73_vm1 = vweird.f32 %v136_v4 }
  0x18   :  { %vm74_vm2 = vmor %vm72_vm0, %vm73_vm1 }
  0x19   :  { %v69_v9 = vsub.f32 1.0, %v68_v5 }
  0x1b   :  { %v70_v11 = vmul.f32 %v136_v4, %v69_v9 }
  0x1d   :  { %v71_v13 = vadd.f32 %v136_v4, %v70_v11 }
  0x1f   :  { %v75_v16 = vsel %vm74_vm2, %v136_v4, %v71_v13 }
  0x20   :  { %v80_v17 = vsel %vm77_vm3, %v79_v12, %v75_v16 }
  0x21   :  { %v83_v18 = vmul.f32 %v82_v14, %v80_v17  ;;  %v89_v19 = vmul.f32 %v88_v15, %v80_v17 }
  0x23   :  { %137 = vlog2.f32 %v83_v18 }
  0x24   :  { %139 = vlog2.f32 %v89_v19 }
  0x29   :  { %v138_v20 = vpop.eup %137 }
  0x2a   :  { %v140_v21 = vpop.eup %139  ;;  %v85_v22 = vmul.f32 0.6931472, %v138_v20 }
  0x2b   :  { %v91_v23 = vmul.f32 0.6931472, %v140_v21 }
  0x2c   :  { %v86_v24 = vmul.f32 %v85_v22, %v63_v0 }
  0x2d   :  { %v92_v25 = vmul.f32 %v91_v23, %v64_v1 }
  0x2f   :  { %v93_v26 = vadd.f32 %v92_v25, %v86_v24 }
  0x31   :  { %100 = vadd.xlane.f32.xlu0 %v93_v26 }
  0xa4   :  { %v101_v27 = vpop.xlane.xlu0 %100 }
  0xa5   :  { %v102_v28 = vrot.slane %v101_v27, 4 }
  0xa7   :  { %v103_v29 = vadd.f32 %v102_v28, %v101_v27 }
  0xa9   :  { %v104_v30 = vrot.slane %v103_v29, 2 }
  0xab   :  { %v105_v31 = vadd.f32 %v104_v30, %v103_v29 }
  0xad   :  { %v106_v32 = vrot.slane %v105_v31, 1 }
  0xaf   :  { %v107_v33 = vadd.f32 %v106_v32, %v105_v31 }
  0xb1   :  { %109 = vst.msk [vmem:[#allocation8] sm:$0x1] %vm108_vm4, %v107_v33 }
  0xb2   :  { %120 = dma.vmem_to_hbm [thread:$0]  %s116_s1, 16, %s118_s21, [#allocation5]  }
  0xb3   :  { %217 = dma.done.wait [#allocation5], 16  }
  0xb4   :  { %218 = vsyncadd [#allocation5], 4294967280 }
  0xb5   :  { %125 = vsyncpa [#allocation4], 1 }
  0xb6   :  { %126 = vsyncpa [#allocation7], 1 }
  0xb7   :  { %127 = vsyncpa [#allocation5], 1 }

</bundles_post_ra>
